<compile_context>
chip_gen: v7x
topology: tpu7x:2x2x1
jax: 0.10.0
libtpu: 0.0.40
codegen_flags: <defaults>
</compile_context>

<pallas_src>
import jax
import jax.numpy as jnp
from jax.experimental import pallas as pl
from jax.experimental.pallas import tpu as pltpu


def _make_kernel(RH, WC, C):
    """RH = TN*H fused row count per block, WC = W*C fused lane count."""

    def kernel(x_ref, p_ref, m_ref, o_ref):
        # x_ref : (RH, WC)  lane-fused activation block (TN whole images)
        # p_ref : (16, WC)  rows 0..8 = lane-tiled 3x3 tap weights (kv*3+ku),
        #                   center tap (row 4) has B folded in; row 9 = D.
        # m_ref : (RH, WC)  0/1 mask, zero where (row mod H) == H-1.
        x = x_ref[...].astype(jnp.float32)
        P = p_ref[...].astype(jnp.float32)
        m0 = m_ref[...]                               # zeros rows h == H-1
        m1 = pltpu.roll(m0, shift=1, axis=0)          # zeros rows h == 0 (XLU)

        # Column (dw) shifts: lane roll by +/- C.  Wrapped lanes at the W
        # boundary contribute nothing because those tap weights are zeroed.
        xl = pltpu.roll(x, shift=C, axis=1)           # x(h, w-1, c)
        xr = pltpu.roll(x, shift=WC - C, axis=1)      # x(h, w+1, c)

        def filt_row(kv):                             # sum_u x(h, w+u) * K(v, u)
            base = 3 * kv
            return (xl * P[base:base + 1, :]
                    + x * P[base + 1:base + 2, :]
                    + xr * P[base + 2:base + 3, :])

        # Center filter row (B folded into the center tap) + additive shift D.
        out = filt_row(1) + P[9:10, :]
        # Filter row v = +1: needs x at row h+1 -> sublane roll up by 1;
        # rows that would wrap (h == H-1, incl. cross-image rows in the fused
        # block) are zeroed by m0.
        out = out + m0 * pltpu.roll(filt_row(2), shift=RH - 1, axis=0)
        # Filter row v = -1: x at row h-1 -> sublane roll down by 1; masked
        # at h == 0 by m1.
        out = out + m1 * pltpu.roll(filt_row(0), shift=1, axis=0)

        o_ref[...] = out.astype(o_ref.dtype)

    return kernel


def _fold_params(params, W, eps):
    """Fold BN1 / 1x1-dw / residual / BN2 into one packed (16, W*C) operand."""
    s1 = params["bn1_gamma"] / jnp.sqrt(params["bn1_var"] + eps)
    t1 = params["bn1_beta"] - params["bn1_mean"] * s1
    s2 = params["bn2_gamma"] / jnp.sqrt(params["bn2_var"] + eps)
    t2 = params["bn2_beta"] - params["bn2_mean"] * s2

    k3 = params["w3_oihw"][:, 0, :, :] * (s1 * s2)[:, None, None]   # (C, 3, 3)
    b_scale = (params["w1"] + 1.0) * s2                             # (C,)
    d_shift = (t1 + params["b1"]) * s2 + t2                         # (C,)
    C = k3.shape[0]

    rows = []
    for kv in range(3):
        for ku in range(3):
            w_lane = jnp.tile(k3[:, kv, ku], W)          # (W*C,)
            if ku == 0:        # reads w-1: invalid at w == 0
                w_lane = w_lane.at[:C].set(0.0)
            elif ku == 2:      # reads w+1: invalid at w == W-1
                w_lane = w_lane.at[(W - 1) * C:].set(0.0)
            rows.append(w_lane)
    # Fold B (residual + 1x1 scale) into the center tap (kv=1, ku=1) = row 4.
    rows[4] = rows[4] + jnp.tile(b_scale, W)
    rows.append(jnp.tile(d_shift, W))                    # row 9 = D
    P = jnp.stack(rows, axis=0).astype(jnp.float32)      # (10, W*C)
    return jnp.pad(P, ((0, 16 - P.shape[0]), (0, 0)))    # (16, W*C)


def _pick_tn(N, H, img_bytes, target_bytes):
    """Images per block: sublane-aligned, ~target-sized, >=2 grid steps if possible."""
    best_t, best_score = N, None
    for t in range(1, N + 1):
        if N % t:
            continue
        if (t * H) % 8 != 0 and t != N:      # keep block sublane-aligned
            continue
        steps = N // t
        score = (
            1 if t * img_bytes <= target_bytes else 0,   # fits the VMEM budget
            1 if (steps >= 2 or N == 1) else 0,          # megacore: >= 2 steps
            t,                                           # bigger amortizes overhead
        )
        if best_score is None or score > best_score:
            best_score, best_t = score, t
    return best_t


def repvggdw_forward(x_nhwc, params, eps=1e-5, block_target_bytes=1 << 20):
    """RepVGGDW forward on NHWC activations (lane-dense end-to-end)."""
    N, H, W, C = x_nhwc.shape
    WC = W * C
    # Free reshape: NHWC row-major == (N*H, W*C) row-major.  WC is a multiple
    # of 128 for all standard RepViT stages -> unmasked lane-dense stores.
    x = x_nhwc.reshape(N * H, WC)

    P = _fold_params(params, W, eps)

    img_bytes = H * WC * x.dtype.itemsize
    TN = _pick_tn(N, H, img_bytes, block_target_bytes)
    RH = TN * H

    # 0/1 row mask: zero where (row mod H) == H-1 (the other mask is derived
    # in-kernel by a sublane roll).
    r = jnp.arange(RH) % H
    M0 = jnp.broadcast_to(
        jnp.where(r == H - 1, 0.0, 1.0).astype(jnp.float32)[:, None], (RH, WC))

    block_bytes = RH * WC * x.dtype.itemsize
    # Budget: double-buffered in/out + mask + in-kernel temporaries; cap at
    # 48 MiB so v7x (64 MiB physical VMEM) keeps headroom for Mosaic scratch.
    vmem_limit = int(min(48 << 20, max(32 << 20, 16 * block_bytes)))

    out = pl.pallas_call(
        _make_kernel(RH, WC, C),
        out_shape=jax.ShapeDtypeStruct((N * H, WC), x.dtype),
        grid=(N // TN,),
        in_specs=[
            pl.BlockSpec((RH, WC), lambda i: (i, 0)),
            pl.BlockSpec((16, WC), lambda i: (0, 0)),
            pl.BlockSpec((RH, WC), lambda i: (0, 0)),
        ],
        out_specs=pl.BlockSpec((RH, WC), lambda i: (i, 0)),
        compiler_params=pltpu.CompilerParams(
            dimension_semantics=("parallel",),
            vmem_limit_bytes=vmem_limit,
        ),
    )(x, P, M0)

    return out.reshape(N, H, W, C)


def repvggdw_forward_nchw(x_nchw, params, eps=1e-5):
    """NCHW adapter (API parity only).  For best performance keep activations
    NHWC end-to-end and call repvggdw_forward directly — each transpose here
    is a full extra HBM read+write pass."""
    x_nhwc = jnp.transpose(x_nchw, (0, 2, 3, 1))
    out = repvggdw_forward(x_nhwc, params, eps)
    return jnp.transpose(out, (0, 3, 1, 2))


def repvggdw_reference_nhwc(x, params, eps=1e-5):
    """Pure-JAX NHWC reference using lax.conv (for correctness checking)."""
    N, H, W, C = x.shape
    w_hwio = jnp.transpose(params["w3_oihw"], (2, 3, 1, 0))   # (3, 3, 1, C)
    conv = jax.lax.conv_general_dilated(
        x, w_hwio, window_strides=(1, 1), padding=((1, 1), (1, 1)),
        dimension_numbers=("NHWC", "HWIO", "NHWC"), feature_group_count=C)
    s1 = params["bn1_gamma"] / jnp.sqrt(params["bn1_var"] + eps)
    y1 = conv * s1 + (params["bn1_beta"] - params["bn1_mean"] * s1)
    y2 = x * params["w1"] + params["b1"]
    z = y1 + y2 + x
    s2 = params["bn2_gamma"] / jnp.sqrt(params["bn2_var"] + eps)
    return z * s2 + (params["bn2_beta"] - params["bn2_mean"] * s2)


if __name__ == "__main__":
    # RepViT channel widths are multiples of 8 (_make_divisible); C=8, W=16
    # makes the fused lane axis W*C = 128 (exactly lane-dense).
    N, C, H, W = 2, 8, 16, 16
    key = jax.random.PRNGKey(0)
    ks = jax.random.split(key, 8)

    x_nhwc = jax.random.normal(ks[0], (N, H, W, C), jnp.float32)

    params = {
        # nn.Conv2d(ed, ed, 3, groups=ed, bias=False).weight : (ed, 1, 3, 3)
        "w3_oihw": 0.2 * jax.random.normal(ks[1], (C, 1, 3, 3), jnp.float32),
        # nn.Conv2d(ed, ed, 1, groups=ed).weight/bias : (ed,) / (ed,)
        "w1": 0.2 * jax.random.normal(ks[2], (C,), jnp.float32),
        "b1": 0.1 * jax.random.normal(ks[3], (C,), jnp.float32),
        # Conv2d_BN's bn: weight init = 1, bias init = 0 (per __init__);
        # running stats made non-trivial for a meaningful test.
        "bn1_gamma": jnp.ones((C,), jnp.float32),
        "bn1_beta": jnp.zeros((C,), jnp.float32),
        "bn1_mean": 0.1 * jax.random.normal(ks[4], (C,), jnp.float32),
        "bn1_var": jnp.abs(jax.random.normal(ks[5], (C,), jnp.float32)) + 0.5,
        # outer bn
        "bn2_gamma": 1.0 + 0.5 * jax.random.normal(ks[6], (C,), jnp.float32),
        "bn2_beta": 0.1 * jax.random.normal(ks[7], (C,), jnp.float32),
        "bn2_mean": jnp.zeros((C,), jnp.float32),
        "bn2_var": jnp.ones((C,), jnp.float32),
    }

    out = jax.block_until_ready(repvggdw_forward(x_nhwc, params))
    ref = repvggdw_reference_nhwc(x_nhwc, params)

    assert out.shape == (N, H, W, C)
    max_err = float(jnp.max(jnp.abs(out - ref)))
    assert jnp.allclose(out, ref, rtol=2e-4, atol=2e-4), f"max_err={max_err}"
    print("KERNEL_OK")
</pallas_src>

<mosaic_0001>
module attributes {stable_mosaic.version = 11 : i64} {
  func.func @kernel(%arg0: i32, %arg1: memref<16x128xf32, #tpu.memory_space<vmem>>, %arg2: memref<16x128xf32, #tpu.memory_space<vmem>>, %arg3: memref<16x128xf32, #tpu.memory_space<vmem>>, %arg4: memref<16x128xf32, #tpu.memory_space<vmem>>) attributes {dimension_semantics = [#tpu.dimension_semantics<parallel>], iteration_bounds = array<i64: 2>, scalar_prefetch = 0 : i64, scratch_operands = 0 : i64, tpu.core_type = #tpu.core_type<tc>, window_params = [{transform_indices = @transform_0, window_bounds = array<i64: 16, 128>}, {pipeline_mode = #tpu.pipeline_mode<synchronous>, transform_indices = @transform_1, window_bounds = array<i64: 16, 128>}, {pipeline_mode = #tpu.pipeline_mode<synchronous>, transform_indices = @transform_2, window_bounds = array<i64: 16, 128>}, {transform_indices = @transform_3, window_bounds = array<i64: 16, 128>}]} {
    %c0 = arith.constant 0 : index
    %c0_0 = arith.constant 0 : index
    %0 = vector.load %arg1[%c0, %c0_0] : memref<16x128xf32, #tpu.memory_space<vmem>>, vector<16x128xf32>
    %c0_1 = arith.constant 0 : index
    %c0_2 = arith.constant 0 : index
    %1 = vector.load %arg2[%c0_1, %c0_2] : memref<16x128xf32, #tpu.memory_space<vmem>>, vector<16x128xf32>
    %c0_3 = arith.constant 0 : index
    %c0_4 = arith.constant 0 : index
    %2 = vector.load %arg3[%c0_3, %c0_4] : memref<16x128xf32, #tpu.memory_space<vmem>>, vector<16x128xf32>
    %c1_i32 = arith.constant 1 : i32
    %3 = tpu.dynamic_rotate %2 by %c1_i32 dim 0 : vector<16x128xf32>, i32 -> vector<16x128xf32>
    %c8_i32 = arith.constant 8 : i32
    %4 = tpu.dynamic_rotate %0 by %c8_i32 dim 1 : vector<16x128xf32>, i32 -> vector<16x128xf32>
    %c120_i32 = arith.constant 120 : i32
    %5 = tpu.dynamic_rotate %0 by %c120_i32 dim 1 : vector<16x128xf32>, i32 -> vector<16x128xf32>
    %6 = vector.extract_strided_slice %1 {offsets = [3, 0], sizes = [1, 128], strides = [1, 1]} : vector<16x128xf32> to vector<1x128xf32>
    %7 = vector.broadcast %6 : vector<1x128xf32> to vector<16x128xf32>
    %8 = arith.mulf %4, %7 : vector<16x128xf32>
    %9 = vector.extract_strided_slice %1 {offsets = [4, 0], sizes = [1, 128], strides = [1, 1]} : vector<16x128xf32> to vector<1x128xf32>
    %10 = vector.broadcast %9 : vector<1x128xf32> to vector<16x128xf32>
    %11 = arith.mulf %0, %10 : vector<16x128xf32>
    %12 = arith.addf %8, %11 : vector<16x128xf32>
    %13 = vector.extract_strided_slice %1 {offsets = [5, 0], sizes = [1, 128], strides = [1, 1]} : vector<16x128xf32> to vector<1x128xf32>
    %14 = vector.broadcast %13 : vector<1x128xf32> to vector<16x128xf32>
    %15 = arith.mulf %5, %14 : vector<16x128xf32>
    %16 = arith.addf %12, %15 : vector<16x128xf32>
    %17 = vector.extract_strided_slice %1 {offsets = [9, 0], sizes = [1, 128], strides = [1, 1]} : vector<16x128xf32> to vector<1x128xf32>
    %18 = vector.broadcast %17 : vector<1x128xf32> to vector<16x128xf32>
    %19 = arith.addf %16, %18 : vector<16x128xf32>
    %20 = vector.extract_strided_slice %1 {offsets = [6, 0], sizes = [1, 128], strides = [1, 1]} : vector<16x128xf32> to vector<1x128xf32>
    %21 = vector.broadcast %20 : vector<1x128xf32> to vector<16x128xf32>
    %22 = arith.mulf %4, %21 : vector<16x128xf32>
    %23 = vector.extract_strided_slice %1 {offsets = [7, 0], sizes = [1, 128], strides = [1, 1]} : vector<16x128xf32> to vector<1x128xf32>
    %24 = vector.broadcast %23 : vector<1x128xf32> to vector<16x128xf32>
    %25 = arith.mulf %0, %24 : vector<16x128xf32>
    %26 = arith.addf %22, %25 : vector<16x128xf32>
    %27 = vector.extract_strided_slice %1 {offsets = [8, 0], sizes = [1, 128], strides = [1, 1]} : vector<16x128xf32> to vector<1x128xf32>
    %28 = vector.broadcast %27 : vector<1x128xf32> to vector<16x128xf32>
    %29 = arith.mulf %5, %28 : vector<16x128xf32>
    %30 = arith.addf %26, %29 : vector<16x128xf32>
    %c15_i32 = arith.constant 15 : i32
    %31 = tpu.dynamic_rotate %30 by %c15_i32 dim 0 : vector<16x128xf32>, i32 -> vector<16x128xf32>
    %32 = arith.mulf %2, %31 : vector<16x128xf32>
    %33 = arith.addf %19, %32 : vector<16x128xf32>
    %34 = vector.extract_strided_slice %1 {offsets = [0, 0], sizes = [1, 128], strides = [1, 1]} : vector<16x128xf32> to vector<1x128xf32>
    %35 = vector.broadcast %34 : vector<1x128xf32> to vector<16x128xf32>
    %36 = arith.mulf %4, %35 : vector<16x128xf32>
    %37 = vector.extract_strided_slice %1 {offsets = [1, 0], sizes = [1, 128], strides = [1, 1]} : vector<16x128xf32> to vector<1x128xf32>
    %38 = vector.broadcast %37 : vector<1x128xf32> to vector<16x128xf32>
    %39 = arith.mulf %0, %38 : vector<16x128xf32>
    %40 = arith.addf %36, %39 : vector<16x128xf32>
    %41 = vector.extract_strided_slice %1 {offsets = [2, 0], sizes = [1, 128], strides = [1, 1]} : vector<16x128xf32> to vector<1x128xf32>
    %42 = vector.broadcast %41 : vector<1x128xf32> to vector<16x128xf32>
    %43 = arith.mulf %5, %42 : vector<16x128xf32>
    %44 = arith.addf %40, %43 : vector<16x128xf32>
    %c1_i32_5 = arith.constant 1 : i32
    %45 = tpu.dynamic_rotate %44 by %c1_i32_5 dim 0 : vector<16x128xf32>, i32 -> vector<16x128xf32>
    %46 = arith.mulf %3, %45 : vector<16x128xf32>
    %47 = arith.addf %33, %46 : vector<16x128xf32>
    %c0_6 = arith.constant 0 : index
    %c0_7 = arith.constant 0 : index
    %48 = vector.load %arg4[%c0_6, %c0_7] : memref<16x128xf32, #tpu.memory_space<vmem>>, vector<16x128xf32>
    tpu.vector_store %arg4[%c0_6, %c0_7], %47 {strides = array<i32>} : memref<16x128xf32, #tpu.memory_space<vmem>>, vector<16x128xf32>,
    return
  }
  func.func @transform_0(%arg0: i32) -> (i32, i32) {
    %c0_i32 = arith.constant 0 : i32
    %c0_i32_0 = arith.constant 0 : i32
    return %arg0, %c0_i32 : i32, i32
  }
  func.func @transform_1(%arg0: i32) -> (i32, i32) {
    %c0_i32 = arith.constant 0 : i32
    %c0_i32_0 = arith.constant 0 : i32
    %c0_i32_1 = arith.constant 0 : i32
    return %c0_i32, %c0_i32_0 : i32, i32
  }
  func.func @transform_2(%arg0: i32) -> (i32, i32) {
    %c0_i32 = arith.constant 0 : i32
    %c0_i32_0 = arith.constant 0 : i32
    %c0_i32_1 = arith.constant 0 : i32
    return %c0_i32, %c0_i32_0 : i32, i32
  }
  func.func @transform_3(%arg0: i32) -> (i32, i32) {
    %c0_i32 = arith.constant 0 : i32
    %c0_i32_0 = arith.constant 0 : i32
    return %arg0, %c0_i32 : i32, i32
  }
}

</mosaic_0001>

<bundles_post_ra>
// kernel: tpu_custom_call.1
= control target key start
LH: loop header
LB: loop body
LE: loop exit
PB: predicated region body
PF: predicated region fallthrough
CT: control target
= control target key end

     0   :  { %8 = vsyncpa [#allocation3], 0  ;;  %s987_s0 = inlined_call_operand.hbm [shape: f32[32,128], index: 0, kind: input, shape index: {}]   ;;  %s988_s1 = inlined_call_operand.hbm [shape: f32[16,128], index: 1, kind: input, shape index: {}]   ;;  %s989_s2 = inlined_call_operand.hbm [shape: f32[16,128], index: 2, kind: input, shape index: {}]   ;;  %s990_s3 = inlined_call_operand.hbm [shape: f32[32,128], index: 3, kind: output, shape index: {}]  }
   0x1   :  { %10 = vsyncpa [#allocation3 + $0x1], 0 }
   0x2   :  { %11 = vsyncpa [#allocation6], 0 }
   0x3   :  { %12 = vsyncpa [#allocation4], 0 }
   0x4   :  { %14 = vsyncpa [#allocation4 + $0x1], 0  ;;  %s717_s12 = smov 0   ;;  %s719_s13 = smov 0  }
   0x5   :  { %s721_s14 = smov 0   ;;  %s723_s15 = smov 0  }
   0x6 LB: > { %s738_s16 = sadd.s32 4294967295, %s686_s15   ;;  %s438_s17 = sadd.s32 4294967294, %s686_s15   ;;  %s686_s15 = sphi %s723_s15, %s1010_s15   ;;  %s682_s14 = sphi %s721_s14, %s1009_s14   ;;  %s678_s13 = sphi %s719_s13, %s1008_s13   ;;  %s674_s12 = sphi %s717_s12, %s1007_s12  }
   0x7   : > { %p40_p0 = scmp.ne.s32.totalorder %s678_s13, %s674_s12  ;;  %p991_p1 = scmp.eq.s32.totalorder %s738_s16, 0 }
   0x8   : > { %p112_p3 = scmp.eq.s32.totalorder %s438_s17, 1  ;;  %p439_p5 = scmp.ge.s32.totalorder %s686_s15, 1 }
   0x9   : > { %p747_p4 = por %p991_p1, %p40_p0  ;;  %p119_p7 = scmp.lt.s32.totalorder %s686_s15, 3 }
   0xa   : > { %p752_p6 = por %p112_p3, %p40_p0  ;;  %s688_s21 = smov [#allocation5]  }
   0xb   : > { %s994_s18 = scalar_select %p747_p4, 1, 0 }
   0xc   : > { %s995_s19 = scalar_select %p752_p6, 1, 0 }
   0xd   : > { %p757_p8 = pnand %p439_p5, %p119_p7  ;;  %s131_s22 = sshll.u32 %s688_s21, 4  ;;  %s761_s22 = int_to_ptr.vmem [resolvable:$true] %s131_s22 }
   0xe   : > { %s689_s24 = smov [#allocation7]   ;;  %s530_s28 = scalar_lea.hbm %s988_s1, 256 }
   0xf   : > { %p470_p9 = pneg %p757_p8  ;;  %s144_s25 = sshll.u32 %s689_s24, 4  ;;  %s772_s25 = int_to_ptr.vmem [resolvable:$true] %s144_s25 }
  0x10   : > { %p531_p12 = scmp.ne.s32.totalorder %s988_s1, %s530_s28  ;;  %p537_p5 = scmp.lt.u32.totalorder %s530_s28, %s988_s1 }
  0x11   : > { %p768_p11 = pnand %p470_p9, %p991_p1 }
  0x13   : > { %p532_p13 = pneg %p768_p11 }
  0x15   : > { %p533_p0 = pnand %p532_p13, %p531_p12 }
  0x17   : > { %p534_p3 = pneg %p533_p0 }
  0x19   : > { %p539_p7 = pnand %p537_p5, %p534_p3 }
  0x1b   : > { %542 = shalt.err (!%p539_p7)
}
  0x1c   : > { %s543_s6 = scalar_lea.vmem %s761_s22, 256  ;;  %p551_p2 = scmp.lt.s32.totalorder %s761_s22, %s761_s22 }
  0x1d   : > { %p544_p9 = scmp.ne.s32.totalorder %s761_s22, %s543_s6  ;;  %p552_p12 = scmp.lt.s32.totalorder %s543_s6, %s543_s6 }
  0x1f   : > { %p546_p10 = pnand %p544_p9, %p532_p13  ;;  %p553_p0 = por %p552_p12, %p551_p2 }
  0x21   : > { %p547_p1 = pneg %p546_p10 }
  0x23   : > { %p554_p6 = pnand %p553_p0, %p547_p1 }
  0x25   : > { %557 = shalt.err (!%p554_p6)
}
  0x26   : > { %s690_s7 = smov 128   ;;  %s691_s8 = smov 8  }
  0x27   : > { %473 = dma.hbm_to_vmem [thread:$0]  (!%p768_p11), %s988_s1, 256, %s761_s22, [#allocation6], %s690_s7, %s690_s7, %s691_s8  }
  0x28   : > { %s558_s21 = scalar_lea.hbm %s989_s2, 256 }
  0x29   : > { %p559_p1 = scmp.ne.s32.totalorder %s989_s2, %s558_s21  ;;  %p565_p10 = scmp.lt.u32.totalorder %s558_s21, %s989_s2 }
  0x2b   : > { %p561_p2 = pnand %p559_p1, %p532_p13 }
  0x2d   : > { %p562_p6 = pneg %p561_p2 }
  0x2f   : > { %p567_p3 = pnand %p565_p10, %p562_p6 }
  0x31   : > { %570 = shalt.err (!%p567_p3)
}
  0x32   : > { %s571_s22 = scalar_lea.vmem %s772_s25, 256  ;;  %p579_p12 = scmp.lt.s32.totalorder %s772_s25, %s772_s25 }
  0x33   : > { %p572_p5 = scmp.ne.s32.totalorder %s772_s25, %s571_s22  ;;  %p580_p0 = scmp.lt.s32.totalorder %s571_s22, %s571_s22 }
  0x35   : > { %p574_p7 = pnand %p572_p5, %p532_p13  ;;  %p581_p1 = por %p580_p0, %p579_p12 }
  0x37   : > { %p575_p9 = pneg %p574_p7 }
  0x39   : > { %p582_p2 = pnand %p581_p1, %p575_p9 }
  0x3b   : > { %585 = shalt.err (!%p582_p2)
}
  0x3c   : > { %476 = dma.hbm_to_vmem [thread:$0]  (!%p768_p11), %s989_s2, 256, %s772_s25, [#allocation6], %s690_s7, %s690_s7, %s691_s8  }
  0x3d   : > { %s833_s23 = sadd.s32 1, %s686_s15   ;;  %s27_s4 = sadd.s32 1, %s682_s14 }
  0x3e   : > { %s24_s5 = ssub.s32 %s686_s15, %s833_s23  ;;  %p34_p13 = scmp.ne.s32.totalorder %s682_s14, %s678_s13 }
  0x3f   : > { %p25_p6 = scmp.eq.s32.totalorder %s24_s5, 0  ;;  %p35_p10 = scmp.eq.s32.totalorder %s686_s15, 0 }
  0x40   : > { %p998_p3 = scmp.eq.s32.totalorder %s738_s16, 1  ;;  %p487_p7 = scmp.lt.s32.totalorder %s686_s15, 2 }
  0x41   : > { %s849_s9 = scalar_select %p25_p6, %s682_s14, %s27_s4  }
  0x42   : > { %p843_p5 = por %p998_p3, %p34_p13  ;;  %p36_p9 = por %p35_p10, %p34_p13 }
  0x43   : > { %s158_s10 = sand.u32 1, %s682_s14   ;;  %s456_s25 = sshll.u32 %s686_s15, 8 }
  0x44   : > { %s999_s6 = scalar_select %p843_p5, 1, 0 }
  0x45   : > { %s443_s11 = sshll.u32 %s158_s10, 4  ;;  %s856_s24 = scalar_lea.hbm %s987_s0, %s456_s25 }
  0x46   : > { %s162_s26 = scalar_lea.vmem [#allocation2], %s443_s11  ;;  %p860_p11 = pnand %p487_p7, %p36_p9 }
  0x47   : > { %s169_s27 = sshll.u32 %s162_s26, 4  ;;  %s864_s22 = scalar_lea.sflag [#allocation3], %s158_s10  ;;  %s858_s27 = int_to_ptr.vmem [resolvable:$true] %s169_s27 }
  0x48   : > { %s586_s29 = scalar_lea.hbm %s856_s24, 256  ;;  %p588_p0 = pneg %p860_p11 }
  0x49   : > { %p587_p12 = scmp.ne.s32.totalorder %s856_s24, %s586_s29  ;;  %s591_s5 = scalar_lea.hbm %s987_s0, 512 }
  0x4a   : > { %p592_p13 = scmp.lt.u32.totalorder %s856_s24, %s987_s0  ;;  %p593_p6 = scmp.lt.u32.totalorder %s591_s5, %s586_s29 }
  0x4b   : > { %p589_p1 = pnand %p588_p0, %p587_p12  ;;  %p595_p3 = scmp.lt.u32.totalorder %s586_s29, %s856_s24 }
  0x4c   : > { %p594_p10 = por %p593_p6, %p592_p13 }
  0x4d   : > { %p590_p2 = pneg %p589_p1 }
  0x4e   : > { %p596_p7 = por %p595_p3, %p594_p10 }
  0x50   : > { %p597_p9 = pnand %p596_p7, %p590_p2 }
  0x52   : > { %600 = shalt.err (!%p597_p9)
}
  0x53   : > { %s601_s10 = scalar_lea.vmem %s858_s27, 256  ;;  %s692_s17 = smov [#allocation2]  }
  0x54   : > { %p602_p12 = scmp.ne.s32.totalorder %s858_s27, %s601_s10  ;;  %s606_s21 = sshll.u32 %s692_s17, 4  ;;  %s607_s21 = int_to_ptr.vmem [resolvable:$false] %s606_s21 }
  0x55   : > { %s608_s26 = scalar_lea.vmem %s607_s21, 512  ;;  %p609_p4 = scmp.lt.s32.totalorder %s858_s27, %s607_s21 }
  0x56   : > { %p604_p1 = pnand %p602_p12, %p588_p0  ;;  %p610_p13 = scmp.lt.s32.totalorder %s608_s26, %s601_s10 }
  0x58   : > { %p605_p5 = pneg %p604_p1  ;;  %p611_p6 = por %p610_p13, %p609_p4 }
  0x5a   : > { %p612_p10 = pnand %p611_p6, %p605_p5 }
  0x5c   : > { %615 = shalt.err (!%p612_p10)
}
  0x5d   : > { %480 = dma.hbm_to_vmem [thread:$0]  (!%p860_p11), %s856_s24, 256, %s858_s27, %s864_s22, %s690_s7, %s690_s7, %s691_s8  }
  0x5e   : > { %181 = sbr.rel (%p757_p8) target bundleno = 255 (0xff), region = 32  ;;  %s898_s29 = sand.u32 (!%p757_p8), 1, %s678_s13  }
  0x5f   : > { %s447_s30 = sshll.u32 (!%p757_p8), %s898_s29, 4  ;;  %s184_s4 = scalar_lea.sflag (!%p757_p8), [#allocation3], %s898_s29 }
  0x60   : > { %s187_s28 = scalar_lea.vmem (!%p757_p8), [#allocation2], %s447_s30  ;;  %p1001_p4 = scmp.ne.s32.totalorder (!%p757_p8), %s994_s18, 0 }
  0x65   : > { %661 = dma.done.wait (%p1001_p4), %s184_s4, 256  }
  0x66   : > { %663 = vsyncadd (%p1001_p4), %s184_s4, 4294967040  ;;  %p1002_p5 = scmp.eq.s32.totalorder %s738_s16, 0 }
  0x68   : > { %665 = dma.done.wait (%p1002_p5), [#allocation6], 512   ;;  %p1003_p8 = pmov %p1002_p5 }
  0x69   : > { %v220_v0 = vld [vmem:[%s187_s28] sm:$0xff]  ;;  %s693_s20 = smov 8   ;;  %s694_s7 = smov 120   ;;  %v221_v1 = vld [vmem:[%s187_s28 + $0x8] sm:$0xff]  ;;  %v228_v2 = vlaneseq }
  0x6a   : > { %667 = vsyncadd (%p1003_p8), [#allocation6], 4294966784  ;;  %233 = vrot.lane.b32.xlu0 %v220_v0, %s693_s20  ;;  %237 = vrot.lane.b32.xlu1 %v220_v0, %s694_s7  ;;  %v222_v5 = vld [vmem:[#allocation5] sm:$0xff]  ;;  %v223_v13 = vld [vmem:[#allocation5 + $0x8] sm:$0xff]  ;;  %s457_s18 = sshll.u32 %s738_s16, 8  ;;  %s217_s8 = scalar_lea.vmem [#allocation8], %s447_s30 }
  0x6b   : > { %v914_v3 = vshrl.u32 %v228_v2, 7  ;;  %v224_v44 = vld [vmem:[#allocation7] sm:$0xff]  ;;  %v225_v45 = vld [vmem:[#allocation7 + $0x8] sm:$0xff]  ;;  %s346_s24 = sshll.u32 %s217_s8, 4  ;;  %s940_s5 = scalar_lea.hbm %s990_s3, %s457_s18  ;;  %s942_s24 = int_to_ptr.vmem [resolvable:$true] %s346_s24 }
  0x6c   : > { %v226_v55 = vrot.slane %v224_v44, 7  ;;  %v227_v56 = vrot.slane %v225_v45, 7  ;;  %s333_s16 = scalar_lea.sflag [#allocation4], %s898_s29  ;;  %s616_s11 = scalar_lea.vmem %s942_s24, 256 }
  0x6d   : > { %v277_v4 = vsub.s32 7, %v914_v3  ;;  %v265_v6 = vsub.s32 1, %v914_v3  ;;  %v271_v7 = vsub.s32 6, %v914_v3  ;;  %v285_v8 = vsub.s32 0, %v914_v3  ;;  %p617_p11 = scmp.ne.s32.totalorder %s942_s24, %s616_s11  ;;  %p1004_p0 = scmp.ne.s32.totalorder %s999_s6, 0 }
  0x6e   : > { %235 = vrot.lane.b32.xlu0 %v221_v1, %s693_s20  ;;  %239 = vrot.lane.b32.xlu1 %v221_v1, %s694_s7  ;;  %v249_v9 = vsub.s32 4, %v914_v3  ;;  %v243_v10 = vsub.s32 3, %v914_v3  ;;  %v316_v14 = vsub.s32 2, %v914_v3  ;;  %v257_v18 = vsub.s32 5, %v914_v3  ;;  %s695_s25 = smov [#allocation8]  }
  0x6f   : > { %v278_v11 = vrot.slane %v222_v5, %v277_v4  ;;  %v309_v12 = vrot.slane %v222_v5, %v265_v6  ;;  %v272_v15 = vrot.slane %v222_v5, %v271_v7  ;;  %v303_v16 = vrot.slane %v222_v5, %v285_v8  ;;  %p618_p2 = pnand %p617_p11, %p1004_p0  ;;  %s620_s10 = sshll.u32 %s695_s25, 4  ;;  %s621_s10 = int_to_ptr.vmem [resolvable:$false] %s620_s10 }
  0x70   : > { %v250_v17 = vrot.slane %v222_v5, %v249_v9  ;;  %v244_v19 = vrot.slane %v222_v5, %v243_v10  ;;  %v286_v21 = vrot.slane %v223_v13, %v285_v8  ;;  %v317_v24 = vrot.slane %v222_v5, %v316_v14  ;;  %s622_s17 = scalar_lea.vmem %s621_s10, 512  ;;  %p623_p7 = scmp.lt.s32.totalorder %s942_s24, %s621_s10 }
  0x71   : > { %v279_v20 = vmul.f32 %v278_v11, %v220_v0  ;;  %v310_v23 = vmul.f32 %v309_v12, %v220_v0  ;;  %v258_v29 = vrot.slane %v222_v5, %v257_v18  ;;  %v280_v36 = vmul.f32 %v278_v11, %v221_v1  ;;  %p619_p3 = pneg %p618_p2  ;;  %p624_p9 = scmp.lt.s32.totalorder %s622_s17, %s616_s11 }
  0x72   : > { %v251_v28 = vmul.f32 %v250_v17, %v220_v0  ;;  %v252_v33 = vmul.f32 %v250_v17, %v221_v1  ;;  %v311_v37 = vmul.f32 %v309_v12, %v221_v1  ;;  %vm230_vm0 = vcmp.lt.s32.totalorder %v914_v3, 1 }
  0x73   : > { %v266_v59 = vrot.slane %v223_v13, %v265_v6  ;;  %vm293_vm1 = vcmp.lt.s32.totalorder %v914_v3, 7  ;;  %v231_v2 = vsel %vm230_vm0, %v226_v55, %v227_v56  ;;  %v232_v4 = vsel %vm230_vm0, %v227_v56, %v226_v55  ;;  %p625_p12 = por %p624_p9, %p623_p7 }
  0x75   : > { %p626_p1 = pnand %p625_p12, %p619_p3 }
  0xdc   : > { %v234_v22 = vpop.permute.xlu0 %233  ;;  %v238_v25 = vpop.permute.xlu1 %237 }
  0xdd   : > { %v273_v26 = vmul.f32 %v272_v15, %v234_v22  ;;  %v304_v27 = vmul.f32 %v303_v16, %v234_v22  ;;  %v245_v30 = vmul.f32 %v244_v19, %v234_v22  ;;  %v287_v32 = vmul.f32 %v286_v21, %v238_v25 }
  0xde   : > { %v318_v35 = vmul.f32 %v317_v24, %v238_v25  ;;  %v259_v41 = vmul.f32 %v258_v29, %v238_v25 }
  0xdf   : > { %v281_v31 = vadd.f32 %v279_v20, %v273_v26  ;;  %v312_v34 = vadd.f32 %v310_v23, %v304_v27  ;;  %v253_v47 = vadd.f32 %v251_v28, %v245_v30 }
  0xe0   : > { %v236_v38 = vpop.permute.xlu0 %235  ;;  %v240_v39 = vpop.permute.xlu1 %239 }
  0xe1   : > { %v246_v40 = vmul.f32 %v244_v19, %v236_v38  ;;  %v274_v42 = vmul.f32 %v272_v15, %v236_v38  ;;  %v305_v43 = vmul.f32 %v303_v16, %v236_v38  ;;  %v288_v46 = vmul.f32 %v286_v21, %v240_v39 }
  0xe2   : > { %v289_v48 = vadd.f32 %v287_v32, %v281_v31  ;;  %v260_v50 = vmul.f32 %v258_v29, %v240_v39  ;;  %v320_v51 = vadd.f32 %v318_v35, %v312_v34  ;;  %v319_v54 = vmul.f32 %v317_v24, %v240_v39 }
  0xe3   : > { %v254_v49 = vadd.f32 %v252_v33, %v246_v40  ;;  %v282_v52 = vadd.f32 %v280_v36, %v274_v42  ;;  %v313_v53 = vadd.f32 %v311_v37, %v305_v43  ;;  %v261_v60 = vadd.f32 %v259_v41, %v253_v47 }
  0xe4   : > { %v291_v62 = vrot.slane %v289_v48, 1  ;;  %v322_v63 = vrot.slane %v320_v51, 7 }
  0xe5   : > { %v290_v57 = vadd.f32 %v288_v46, %v282_v52  ;;  %v321_v58 = vadd.f32 %v319_v54, %v313_v53  ;;  %v262_v61 = vadd.f32 %v260_v50, %v254_v49  ;;  %v267_v9 = vadd.f32 %v266_v59, %v261_v60 }
  0xe7   : > { %v292_v0 = vrot.slane %v290_v57, 1  ;;  %v323_v1 = vrot.slane %v321_v58, 7  ;;  %v268_v10 = vadd.f32 %v266_v59, %v262_v61 }
  0xe9   : > { %v294_v5 = vsel %vm293_vm1, %v291_v62, %v292_v0  ;;  %v295_v7 = vsel %vm293_vm1, %v292_v0, %v291_v62  ;;  %v324_v6 = vsel %vm230_vm0, %v322_v63, %v323_v1  ;;  %v325_v8 = vsel %vm230_vm0, %v323_v1, %v322_v63 }
  0xea   : > { %v296_v11 = vmul.f32 %v294_v5, %v224_v44  ;;  %v297_v12 = vmul.f32 %v295_v7, %v225_v45  ;;  %v326_v15 = vmul.f32 %v325_v8, %v232_v4  ;;  %v327_v16 = vmul.f32 %v324_v6, %v231_v2 }
  0xec   : > { %v298_v13 = vadd.f32 %v296_v11, %v267_v9  ;;  %v299_v14 = vadd.f32 %v297_v12, %v268_v10 }
  0xee   : > { %v328_v3 = vadd.f32 %v326_v15, %v298_v13  ;;  %v329_v17 = vadd.f32 %v327_v16, %v299_v14 }
  0xf0   : > { %331 = vst [vmem:[%s217_s8 + $0x8] sm:$0xff] %v329_v17  ;;  %330 = vst [vmem:[%s217_s8] sm:$0xff] %v328_v3 }
  0xf1   : > { %629 = shalt.err (!%p626_p1)
}
  0xf2   : > { %s630_s21 = scalar_lea.hbm %s940_s5, 256  ;;  %s634_s4 = scalar_lea.hbm %s990_s3, 512 }
  0xf3   : > { %p631_p13 = scmp.ne.s32.totalorder %s940_s5, %s630_s21  ;;  %p635_p4 = scmp.lt.u32.totalorder %s940_s5, %s990_s3 }
  0xf4   : > { %p636_p5 = scmp.lt.u32.totalorder %s634_s4, %s630_s21  ;;  %p638_p11 = scmp.lt.u32.totalorder %s630_s21, %s940_s5 }
  0xf5   : > { %p632_p6 = pnand %p631_p13, %p1004_p0 }
  0xf6   : > { %p637_p8 = por %p636_p5, %p635_p4 }
  0xf7   : > { %p633_p10 = pneg %p632_p6 }
  0xf8   : > { %p639_p2 = por %p638_p11, %p637_p8 }
  0xfa   : > { %p640_p3 = pnand %p639_p2, %p633_p10 }
  0xfc   : > { %643 = shalt.err (!%p640_p3)
}
  0xfd   : > { %s696_s18 = smov 128  }
  0xfe   : > { %468 = dma.vmem_to_hbm [thread:$0]  (%p1004_p0), %s942_s24, 256, %s940_s5, %s333_s16, %s696_s18, %s696_s18, %s693_s20  }
  0xff PF: > { %s361_s8 = sand.u32 1, %s674_s12   ;;  %p1005_p7 = scmp.ne.s32.totalorder %s995_s19, 0 }
 0x100   : > { %p1006_p9 = scmp.ge.s32.totalorder %s686_s15, 2  ;;  %s362_s27 = scalar_lea.sflag [#allocation4], %s361_s8 }
 0x102   : > { %p482_p12 = pnand %p1006_p9, %p1005_p7 }
 0x104   : > { %669 = dma.done.wait (!%p482_p12), %s362_s27, 256  }
 0x105   : > { %671 = vsyncadd (!%p482_p12), %s362_s27, 4294967040  ;;  %p17_p1 = scmp.ge.s32.totalorder %s833_s23, 4   ;;  %s1007_s12 = smov %s678_s13 }
 0x106   : > { %s1008_s13 = smov %s682_s14  ;;  %s1009_s14 = smov %s849_s9 }
 0x107   : > { %s1010_s15 = smov %s833_s23  ;;  %19 = sbr.rel (!%p17_p1) target bundleno = 6 (0x6), region = 85 }
 0x10e   :  { %367 = vsyncpa [#allocation3], 1 }
 0x10f   :  { %369 = vsyncpa [#allocation3 + $0x1], 1 }
 0x110   :  { %370 = vsyncpa [#allocation6], 1 }
 0x111   :  { %371 = vsyncpa [#allocation4], 1 }
 0x112   :  { %373 = vsyncpa [#allocation4 + $0x1], 1 }

</bundles_post_ra>
